<compile_context>
chip_gen: v5e
topology: v5e:2x2
jax: 0.10.0
libtpu: 0.0.40
codegen_flags: <defaults>
</compile_context>

<pallas_src>
import functools

import jax
import jax.numpy as jnp
from jax.experimental import pallas as pl
from jax.experimental.pallas import tpu as pltpu


def _lstm_kernel(x_ref, wih_ref, whh_ref, b_ref, wfc_ref, bfc_ref,
                 out_ref, gx_sc, h_sc, c_sc, *, seq_len, unroll, time_padded):
    """One (batch block, time block) grid step of the LSTM.

    x_ref   : (Ts*Bb, I)  time-major input rows (row = t_local*Bb + b)
    wih_ref : (I, 4H)     input weights^T, i/f/o columns pre-scaled by 0.5
    whh_ref : (H, 4H)     recurrent weights^T, i/f/o columns pre-scaled by 0.5
    b_ref   : (1, 4H)     fused bias (b_ih+b_hh), i/f/o pre-scaled by 0.5 (f32)
    wfc_ref : (H, C)      FC head weights^T
    bfc_ref : (1, C)      FC head bias
    out_ref : (Bb, C)     logits (written on the last time block)
    gx_sc   : (Ts*Bb, 4H) f32 scratch: x-side gate pre-activations
    h_sc/c_sc : (Bb, H)   f32 recurrent state, persists across time blocks
    """
    ti = pl.program_id(1)
    nt = pl.num_programs(1)

    H = whh_ref.shape[0]
    Bb = h_sc.shape[0]
    Ts = x_ref.shape[0] // Bb

    # h0 = c0 = 0 (nn.LSTM default); re-init at the start of each batch block.
    # Correct because the time axis is the innermost ("arbitrary") grid axis.
    @pl.when(ti == 0)
    def _():
        h_sc[...] = jnp.zeros_like(h_sc)
        c_sc[...] = jnp.zeros_like(c_sc)

    # Fused input projection: ONE GEMM per time block, off the serial chain.
    # (MXU is nearly idle during the recurrence, so this is free compute and
    # removes the gates_x HBM round trip entirely.)
    gx_sc[...] = (
        jnp.dot(x_ref[...], wih_ref[...], preferred_element_type=jnp.float32)
        + b_ref[...])

    whh = whh_ref[...]  # (H, 4H), loaded once per block
    # TODO(synk): for a further serial-latency win, hold whh in MXU weight
    # registers across the step loop via pltpu.matmul_push_rhs/acc_lhs/pop.

    # Static lane mask selecting the tanh-activated 'g' gate out of the packed
    # [i, f, g, o] lane axis; hoisted out of the step loop.
    lane = jax.lax.broadcasted_iota(jnp.int32, (Bb, 4 * H), 1)
    g_mask = (lane >= 2 * H) & (lane < 3 * H)

    def step(tl, carry):
        h, c = carry
        row0 = pl.multiple_of(tl * Bb, Bb)
        # Only the recurrent matmul remains on the serial dependence chain.
        gates = gx_sc[pl.ds(row0, Bb), :] + jnp.dot(
            h.astype(whh.dtype), whh, preferred_element_type=jnp.float32)
        # ONE full-width tanh pass (EUP); sigmoid gates recovered on the VPU.
        t = jnp.tanh(gates)
        act = jnp.where(g_mask, t, 0.5 * t + 0.5)   # activated [i, f, g, o]
        i_g = act[:, 0 * H:1 * H]
        f_g = act[:, 1 * H:2 * H]
        g_g = act[:, 2 * H:3 * H]
        o_g = act[:, 3 * H:4 * H]
        c_new = f_g * c + i_g * g_g
        h_new = o_g * jnp.tanh(c_new)
        if time_padded:   # trace-time bool: only emitted when S was padded
            valid = (ti * Ts + tl) < seq_len
            h_new = jnp.where(valid, h_new, h)
            c_new = jnp.where(valid, c_new, c)
        return h_new, c_new

    h, c = jax.lax.fori_loop(0, Ts, step, (h_sc[...], c_sc[...]), unroll=unroll)
    h_sc[...] = h
    c_sc[...] = c

    # FC head on h_T (== hn[-1]) once, on the last time block of this batch
    # block.  The out index_map is constant in ti, so writeback is deferred.
    @pl.when(ti == nt - 1)
    def _():
        out_ref[...] = (
            jnp.dot(h.astype(wfc_ref.dtype), wfc_ref[...],
                    preferred_element_type=jnp.float32)
            + bfc_ref[...]
        ).astype(out_ref.dtype)


def lstm_model_forward(x, params, *, time_block_cap=32, batch_block=None,
                       matmul_dtype=None,
                       vmem_limit_bytes=32 * 1024 * 1024):
    """x: (batch, seq, input_size) float32. Returns (batch, num_classes).

    batch_block: set to a multiple of 8 that divides the padded batch to split
      the "parallel" batch grid axis across v7x's two TensorCores (keep None,
      i.e. one block, on single-TC v5e/v6e).
    matmul_dtype: e.g. jnp.bfloat16 to cast MXU operands only (f32 accumulate,
      f32 gate math) for production H on v6e/v7x.  None keeps full f32.
    vmem_limit_bytes: raise toward ~96-112 MiB on v5e/v6e (keep <= ~48 MiB on
      v7x) when Ts/Bb are production-sized.
    """
    B, S, I = x.shape
    w_ih, w_hh, b_ih, b_hh, w_fc, b_fc = (
        params["w_ih"], params["w_hh"], params["b_ih"],
        params["b_hh"], params["w_fc"], params["b_fc"])
    H = w_hh.shape[1]
    C = w_fc.shape[0]
    mm_dtype = jnp.float32 if matmul_dtype is None else matmul_dtype

    # ---- One-tanh gate pre-scaling (PyTorch gate order [i, f, g, o]) -------
    # sigmoid(z) == 0.5*tanh(z/2) + 0.5, so halve the i/f/o columns here and
    # evaluate a single tanh in-kernel.  Multiplying by 0.5 is exact in fp32.
    gate_scale = jnp.concatenate([
        jnp.full((2 * H,), 0.5, jnp.float32),   # i, f
        jnp.ones((H,), jnp.float32),            # g (plain tanh)
        jnp.full((H,), 0.5, jnp.float32),       # o
    ])
    wih_t = (jnp.transpose(w_ih).astype(jnp.float32) * gate_scale[None, :])  # (I, 4H)
    whh_t = (jnp.transpose(w_hh).astype(jnp.float32) * gate_scale[None, :])  # (H, 4H)
    bias = ((b_ih + b_hh).astype(jnp.float32) * gate_scale).reshape(1, 4 * H)
    wfc_t = jnp.transpose(w_fc).astype(jnp.float32)                          # (H, C)
    bfc = b_fc.astype(jnp.float32).reshape(1, C)

    # MXU operands only; gate math / biases stay f32 (mandatory on v5e).
    wih_t = wih_t.astype(mm_dtype)
    whh_t = whh_t.astype(mm_dtype)
    wfc_t = wfc_t.astype(mm_dtype)

    # ---- Batch / time blocking ---------------------------------------------
    B_pad = ((B + 7) // 8) * 8                 # sublane-tile multiple
    Bb = B_pad if batch_block is None else batch_block
    assert Bb % 8 == 0 and B_pad % Bb == 0, "batch_block must be mult of 8 dividing padded B"
    nb = B_pad // Bb

    Ts = min(S, time_block_cap)                # never degenerates to Ts=1
    S_pad = ((S + Ts - 1) // Ts) * Ts
    nt = S_pad // Ts
    time_padded = (S_pad != S)

    # Time-major x, padded, regrouped per batch block so each kernel block is
    # a contiguous (Ts*Bb, I) slab with row = t_local*Bb + b.  These are cheap
    # XLA ops on x (O(S*B*I)); the 4H-wide gates_x never touches HBM.
    x_tm = jnp.transpose(x.astype(mm_dtype), (1, 0, 2))            # (S, B, I)
    x_tm = jnp.pad(x_tm, ((0, S_pad - S), (0, B_pad - B), (0, 0)))
    x_blk = (x_tm.reshape(S_pad, nb, Bb, I)
                 .transpose(1, 0, 2, 3)
                 .reshape(nb, S_pad * Bb, I))                      # (nb, S_pad*Bb, I)

    # Capped unroll once 4H spans several vregs (avoids spills at big H);
    # full unroll at demo sizes.
    unroll = True if 4 * H <= 512 else min(8, Ts)

    kernel = functools.partial(_lstm_kernel, seq_len=S, unroll=unroll,
                               time_padded=time_padded)

    # NOTE(production): add pipeline_mode=pl.Buffered(1) to the constant-index
    # weight specs below to reclaim their double-buffer VMEM at large H, and
    # pad C to a 128 multiple for lane-dense FC writeback.  Both are no-ops at
    # H=32 / C=8 and are left off here.
    grid_spec = pltpu.PrefetchScalarGridSpec(
        num_scalar_prefetch=0,
        grid=(nb, nt),   # (batch "parallel" for v7x megacore, time "arbitrary")
        in_specs=[
            pl.BlockSpec((None, Ts * Bb, I), lambda bi, ti: (bi, ti, 0)),  # x slab
            pl.BlockSpec((I, 4 * H), lambda bi, ti: (0, 0)),               # W_ih^T
            pl.BlockSpec((H, 4 * H), lambda bi, ti: (0, 0)),               # W_hh^T
            pl.BlockSpec((1, 4 * H), lambda bi, ti: (0, 0)),               # fused bias
            pl.BlockSpec((H, C), lambda bi, ti: (0, 0)),                   # W_fc^T
            pl.BlockSpec((1, C), lambda bi, ti: (0, 0)),                   # b_fc
        ],
        out_specs=pl.BlockSpec((Bb, C), lambda bi, ti: (bi, 0)),
        scratch_shapes=[
            pltpu.VMEM((Ts * Bb, 4 * H), jnp.float32),   # gx (x-side gates)
            pltpu.VMEM((Bb, H), jnp.float32),            # h state
            pltpu.VMEM((Bb, H), jnp.float32),            # c state
        ],
    )

    out = pl.pallas_call(
        kernel,
        out_shape=jax.ShapeDtypeStruct((B_pad, C), jnp.float32),
        grid_spec=grid_spec,
        compiler_params=pltpu.CompilerParams(
            dimension_semantics=("parallel", "arbitrary"),
            vmem_limit_bytes=vmem_limit_bytes),
    )(x_blk, wih_t, whh_t, bias, wfc_t, bfc)
    return out[:B]


def lstm_model_reference(x, params):
    """Pure-JAX reference matching torch.nn.LSTM + Linear semantics."""
    w_ih, w_hh, b_ih, b_hh, w_fc, b_fc = (
        params["w_ih"], params["w_hh"], params["b_ih"],
        params["b_hh"], params["w_fc"], params["b_fc"])
    B = x.shape[0]
    H = w_hh.shape[1]

    def step(carry, x_t):
        h, c = carry
        gates = x_t @ w_ih.T + h @ w_hh.T + b_ih + b_hh
        i = jax.nn.sigmoid(gates[:, 0 * H:1 * H])
        f = jax.nn.sigmoid(gates[:, 1 * H:2 * H])
        g = jnp.tanh(gates[:, 2 * H:3 * H])
        o = jax.nn.sigmoid(gates[:, 3 * H:4 * H])
        c = f * c + i * g
        h = o * jnp.tanh(c)
        return (h, c), None

    h0 = jnp.zeros((B, H), jnp.float32)
    c0 = jnp.zeros((B, H), jnp.float32)
    (hT, _), _ = jax.lax.scan(step, (h0, c0), jnp.transpose(x, (1, 0, 2)))
    return hT @ w_fc.T + b_fc


def init_params(key, input_size, hidden_size, num_classes):
    ks = jax.random.split(key, 6)
    k = 1.0 / jnp.sqrt(hidden_size)   # PyTorch-style uniform(-1/sqrt(H), 1/sqrt(H))
    u = lambda kk, shape: jax.random.uniform(kk, shape, jnp.float32, -k, k)
    return {
        "w_ih": u(ks[0], (4 * hidden_size, input_size)),
        "w_hh": u(ks[1], (4 * hidden_size, hidden_size)),
        "b_ih": u(ks[2], (4 * hidden_size,)),
        "b_hh": u(ks[3], (4 * hidden_size,)),
        "w_fc": u(ks[4], (num_classes, hidden_size)),
        "b_fc": u(ks[5], (num_classes,)),
    }


if __name__ == "__main__":
    batch, seq, input_size, hidden_size, num_classes = 8, 8, 16, 32, 8

    key = jax.random.PRNGKey(0)
    kx, kp = jax.random.split(key)
    x = jax.random.normal(kx, (batch, seq, input_size), jnp.float32)
    params = init_params(kp, input_size, hidden_size, num_classes)

    out = jax.block_until_ready(lstm_model_forward(x, params))
    ref = lstm_model_reference(x, params)

    assert out.shape == (batch, num_classes)
    assert jnp.allclose(out, ref, atol=1e-4, rtol=1e-4), "mismatch vs reference"

    print("KERNEL_OK")
</pallas_src>

<mosaic_0001>
module attributes {stable_mosaic.version = 11 : i64} {
  func.func @_lstm_kernel(%arg0: i32, %arg1: i32, %arg2: memref<1x64x16xf32, #tpu.memory_space<vmem>>, %arg3: memref<16x128xf32, #tpu.memory_space<vmem>>, %arg4: memref<32x128xf32, #tpu.memory_space<vmem>>, %arg5: memref<1x128xf32, #tpu.memory_space<vmem>>, %arg6: memref<32x8xf32, #tpu.memory_space<vmem>>, %arg7: memref<1x8xf32, #tpu.memory_space<vmem>>, %arg8: memref<8x8xf32, #tpu.memory_space<vmem>>, %arg9: memref<64x128xf32, #tpu.memory_space<vmem>>, %arg10: memref<8x32xf32, #tpu.memory_space<vmem>>, %arg11: memref<8x32xf32, #tpu.memory_space<vmem>>) attributes {dimension_semantics = [#tpu.dimension_semantics<parallel>, #tpu.dimension_semantics<arbitrary>], iteration_bounds = array<i64: 1, 1>, scalar_prefetch = 0 : i64, scratch_operands = 3 : i64, tpu.core_type = #tpu.core_type<tc>, window_params = [{transform_indices = @transform_0, window_bounds = array<i64: 1, 64, 16>}, {pipeline_mode = #tpu.pipeline_mode<synchronous>, transform_indices = @transform_1, window_bounds = array<i64: 16, 128>}, {pipeline_mode = #tpu.pipeline_mode<synchronous>, transform_indices = @transform_2, window_bounds = array<i64: 32, 128>}, {pipeline_mode = #tpu.pipeline_mode<synchronous>, transform_indices = @transform_3, window_bounds = array<i64: 1, 128>}, {pipeline_mode = #tpu.pipeline_mode<synchronous>, transform_indices = @transform_4, window_bounds = array<i64: 32, 8>}, {pipeline_mode = #tpu.pipeline_mode<synchronous>, transform_indices = @transform_5, window_bounds = array<i64: 1, 8>}, {transform_indices = @transform_6, window_bounds = array<i64: 8, 8>}]} {
    %c0_i32 = arith.constant 0 : i32
    %0 = arith.cmpi eq, %arg1, %c0_i32 : i32
    %1 = arith.extui %0 : i1 to i32
    %c0_i32_0 = arith.constant 0 : i32
    %2 = arith.cmpi ne, %1, %c0_i32_0 : i32
    scf.if %2 {
      %cst_62 = arith.constant 0.000000e+00 : f32
      %193 = vector.broadcast %cst_62 : f32 to vector<8x32xf32>
      %c0_63 = arith.constant 0 : index
      %c0_64 = arith.constant 0 : index
      %194 = vector.load %arg10[%c0_63, %c0_64] : memref<8x32xf32, #tpu.memory_space<vmem>>, vector<8x32xf32>
      tpu.vector_store %arg10[%c0_63, %c0_64], %193 {strides = array<i32>} : memref<8x32xf32, #tpu.memory_space<vmem>>, vector<8x32xf32>,
      %cst_65 = arith.constant 0.000000e+00 : f32
      %195 = vector.broadcast %cst_65 : f32 to vector<8x32xf32>
      %c0_66 = arith.constant 0 : index
      %c0_67 = arith.constant 0 : index
      %196 = vector.load %arg11[%c0_66, %c0_67] : memref<8x32xf32, #tpu.memory_space<vmem>>, vector<8x32xf32>
      tpu.vector_store %arg11[%c0_66, %c0_67], %195 {strides = array<i32>} : memref<8x32xf32, #tpu.memory_space<vmem>>, vector<8x32xf32>,
    } else {
    }
    %c0 = arith.constant 0 : index
    %c0_1 = arith.constant 0 : index
    %c0_2 = arith.constant 0 : index
    %3 = vector.load %arg2[%c0, %c0_1, %c0_2] : memref<1x64x16xf32, #tpu.memory_space<vmem>>, vector<1x64x16xf32>
    %4 = vector.shape_cast %3 : vector<1x64x16xf32> to vector<64x16xf32>
    %c0_3 = arith.constant 0 : index
    %c0_4 = arith.constant 0 : index
    %5 = vector.load %arg3[%c0_3, %c0_4] : memref<16x128xf32, #tpu.memory_space<vmem>>, vector<16x128xf32>
    %cst = arith.constant dense<0.000000e+00> : vector<64x128xf32>
    %6 = tpu.matmul %4, %5, %cst {dimension_numbers = #tpu.dot_dimension_numbers<[1], [0], [0], [1], [0, 0, 1, 1], [], []>} : vector<64x16xf32>, vector<16x128xf32>, vector<64x128xf32> -> vector<64x128xf32>
    %c0_5 = arith.constant 0 : index
    %c0_6 = arith.constant 0 : index
    %7 = vector.load %arg5[%c0_5, %c0_6] : memref<1x128xf32, #tpu.memory_space<vmem>>, vector<1x128xf32>
    %8 = vector.broadcast %7 : vector<1x128xf32> to vector<64x128xf32>
    %9 = arith.addf %6, %8 : vector<64x128xf32>
    %c0_7 = arith.constant 0 : index
    %c0_8 = arith.constant 0 : index
    %10 = vector.load %arg9[%c0_7, %c0_8] : memref<64x128xf32, #tpu.memory_space<vmem>>, vector<64x128xf32>
    tpu.vector_store %arg9[%c0_7, %c0_8], %9 {strides = array<i32>} : memref<64x128xf32, #tpu.memory_space<vmem>>, vector<64x128xf32>,
    %c0_9 = arith.constant 0 : index
    %c0_10 = arith.constant 0 : index
    %11 = vector.load %arg4[%c0_9, %c0_10] : memref<32x128xf32, #tpu.memory_space<vmem>>, vector<32x128xf32>
    %12 = tpu.iota {dimensions = array<i32: 1>} : vector<8x128xi32>
    %c64_i32 = arith.constant 64 : i32
    %13 = vector.broadcast %c64_i32 : i32 to vector<8x128xi32>
    %14 = arith.cmpi sge, %12, %13 : vector<8x128xi32>
    %c96_i32 = arith.constant 96 : i32
    %15 = vector.broadcast %c96_i32 : i32 to vector<8x128xi32>
    %16 = arith.cmpi slt, %12, %15 : vector<8x128xi32>
    %17 = arith.andi %14, %16 : vector<8x128xi1>
    %c0_11 = arith.constant 0 : index
    %c0_12 = arith.constant 0 : index
    %18 = vector.load %arg10[%c0_11, %c0_12] : memref<8x32xf32, #tpu.memory_space<vmem>>, vector<8x32xf32>
    %c0_13 = arith.constant 0 : index
    %c0_14 = arith.constant 0 : index
    %19 = vector.load %arg11[%c0_13, %c0_14] : memref<8x32xf32, #tpu.memory_space<vmem>>, vector<8x32xf32>
    %c0_i32_15 = arith.constant 0 : i32
    %c8_i32 = arith.constant 8 : i32
    %20 = arith.muli %c0_i32_15, %c8_i32 : i32
    %21 = tpu.assume_multiple %20, 8 : i32
    %22 = arith.index_cast %21 : i32 to index
    %c0_16 = arith.constant 0 : index
    %23 = vector.load %arg9[%22, %c0_16] : memref<64x128xf32, #tpu.memory_space<vmem>>, vector<8x128xf32>
    %cst_17 = arith.constant dense<0.000000e+00> : vector<8x128xf32>
    %24 = tpu.matmul %18, %11, %cst_17 {dimension_numbers = #tpu.dot_dimension_numbers<[1], [0], [0], [1], [0, 0, 1, 1], [], []>} : vector<8x32xf32>, vector<32x128xf32>, vector<8x128xf32> -> vector<8x128xf32>
    %25 = arith.addf %23, %24 : vector<8x128xf32>
    %26 = math.tanh %25 : vector<8x128xf32>
    %cst_18 = arith.constant 5.000000e-01 : f32
    %27 = vector.broadcast %cst_18 : f32 to vector<8x128xf32>
    %28 = arith.mulf %27, %26 : vector<8x128xf32>
    %cst_19 = arith.constant 5.000000e-01 : f32
    %29 = vector.broadcast %cst_19 : f32 to vector<8x128xf32>
    %30 = arith.addf %28, %29 : vector<8x128xf32>
    %31 = arith.select %17, %26, %30 : vector<8x128xi1>, vector<8x128xf32>
    %32 = vector.extract_strided_slice %31 {offsets = [0, 0], sizes = [8, 32], strides = [1, 1]} : vector<8x128xf32> to vector<8x32xf32>
    %33 = vector.extract_strided_slice %31 {offsets = [0, 32], sizes = [8, 32], strides = [1, 1]} : vector<8x128xf32> to vector<8x32xf32>
    %34 = vector.extract_strided_slice %31 {offsets = [0, 64], sizes = [8, 32], strides = [1, 1]} : vector<8x128xf32> to vector<8x32xf32>
    %35 = vector.extract_strided_slice %31 {offsets = [0, 96], sizes = [8, 32], strides = [1, 1]} : vector<8x128xf32> to vector<8x32xf32>
    %36 = arith.mulf %33, %19 : vector<8x32xf32>
    %37 = arith.mulf %32, %34 : vector<8x32xf32>
    %38 = arith.addf %36, %37 : vector<8x32xf32>
    %39 = math.tanh %38 : vector<8x32xf32>
    %40 = arith.mulf %35, %39 : vector<8x32xf32>
    %c1_i32 = arith.constant 1 : i32
    %c8_i32_20 = arith.constant 8 : i32
    %41 = arith.muli %c1_i32, %c8_i32_20 : i32
    %42 = tpu.assume_multiple %41, 8 : i32
    %43 = arith.index_cast %42 : i32 to index
    %c0_21 = arith.constant 0 : index
    %44 = vector.load %arg9[%43, %c0_21] : memref<64x128xf32, #tpu.memory_space<vmem>>, vector<8x128xf32>
    %cst_22 = arith.constant dense<0.000000e+00> : vector<8x128xf32>
    %45 = tpu.matmul %40, %11, %cst_22 {dimension_numbers = #tpu.dot_dimension_numbers<[1], [0], [0], [1], [0, 0, 1, 1], [], []>} : vector<8x32xf32>, vector<32x128xf32>, vector<8x128xf32> -> vector<8x128xf32>
    %46 = arith.addf %44, %45 : vector<8x128xf32>
    %47 = math.tanh %46 : vector<8x128xf32>
    %cst_23 = arith.constant 5.000000e-01 : f32
    %48 = vector.broadcast %cst_23 : f32 to vector<8x128xf32>
    %49 = arith.mulf %48, %47 : vector<8x128xf32>
    %cst_24 = arith.constant 5.000000e-01 : f32
    %50 = vector.broadcast %cst_24 : f32 to vector<8x128xf32>
    %51 = arith.addf %49, %50 : vector<8x128xf32>
    %52 = arith.select %17, %47, %51 : vector<8x128xi1>, vector<8x128xf32>
    %53 = vector.extract_strided_slice %52 {offsets = [0, 0], sizes = [8, 32], strides = [1, 1]} : vector<8x128xf32> to vector<8x32xf32>
    %54 = vector.extract_strided_slice %52 {offsets = [0, 32], sizes = [8, 32], strides = [1, 1]} : vector<8x128xf32> to vector<8x32xf32>
    %55 = vector.extract_strided_slice %52 {offsets = [0, 64], sizes = [8, 32], strides = [1, 1]} : vector<8x128xf32> to vector<8x32xf32>
    %56 = vector.extract_strided_slice %52 {offsets = [0, 96], sizes = [8, 32], strides = [1, 1]} : vector<8x128xf32> to vector<8x32xf32>
    %57 = arith.mulf %54, %38 : vector<8x32xf32>
    %58 = arith.mulf %53, %55 : vector<8x32xf32>
    %59 = arith.addf %57, %58 : vector<8x32xf32>
    %60 = math.tanh %59 : vector<8x32xf32>
    %61 = arith.mulf %56, %60 : vector<8x32xf32>
    %c2_i32 = arith.constant 2 : i32
    %c8_i32_25 = arith.constant 8 : i32
    %62 = arith.muli %c2_i32, %c8_i32_25 : i32
    %63 = tpu.assume_multiple %62, 8 : i32
    %64 = arith.index_cast %63 : i32 to index
    %c0_26 = arith.constant 0 : index
    %65 = vector.load %arg9[%64, %c0_26] : memref<64x128xf32, #tpu.memory_space<vmem>>, vector<8x128xf32>
    %cst_27 = arith.constant dense<0.000000e+00> : vector<8x128xf32>
    %66 = tpu.matmul %61, %11, %cst_27 {dimension_numbers = #tpu.dot_dimension_numbers<[1], [0], [0], [1], [0, 0, 1, 1], [], []>} : vector<8x32xf32>, vector<32x128xf32>, vector<8x128xf32> -> vector<8x128xf32>
    %67 = arith.addf %65, %66 : vector<8x128xf32>
    %68 = math.tanh %67 : vector<8x128xf32>
    %cst_28 = arith.constant 5.000000e-01 : f32
    %69 = vector.broadcast %cst_28 : f32 to vector<8x128xf32>
    %70 = arith.mulf %69, %68 : vector<8x128xf32>
    %cst_29 = arith.constant 5.000000e-01 : f32
    %71 = vector.broadcast %cst_29 : f32 to vector<8x128xf32>
    %72 = arith.addf %70, %71 : vector<8x128xf32>
    %73 = arith.select %17, %68, %72 : vector<8x128xi1>, vector<8x128xf32>
    %74 = vector.extract_strided_slice %73 {offsets = [0, 0], sizes = [8, 32], strides = [1, 1]} : vector<8x128xf32> to vector<8x32xf32>
    %75 = vector.extract_strided_slice %73 {offsets = [0, 32], sizes = [8, 32], strides = [1, 1]} : vector<8x128xf32> to vector<8x32xf32>
    %76 = vector.extract_strided_slice %73 {offsets = [0, 64], sizes = [8, 32], strides = [1, 1]} : vector<8x128xf32> to vector<8x32xf32>
    %77 = vector.extract_strided_slice %73 {offsets = [0, 96], sizes = [8, 32], strides = [1, 1]} : vector<8x128xf32> to vector<8x32xf32>
    %78 = arith.mulf %75, %59 : vector<8x32xf32>
    %79 = arith.mulf %74, %76 : vector<8x32xf32>
    %80 = arith.addf %78, %79 : vector<8x32xf32>
    %81 = math.tanh %80 : vector<8x32xf32>
    %82 = arith.mulf %77, %81 : vector<8x32xf32>
    %c3_i32 = arith.constant 3 : i32
    %c8_i32_30 = arith.constant 8 : i32
    %83 = arith.muli %c3_i32, %c8_i32_30 : i32
    %84 = tpu.assume_multiple %83, 8 : i32
    %85 = arith.index_cast %84 : i32 to index
    %c0_31 = arith.constant 0 : index
    %86 = vector.load %arg9[%85, %c0_31] : memref<64x128xf32, #tpu.memory_space<vmem>>, vector<8x128xf32>
    %cst_32 = arith.constant dense<0.000000e+00> : vector<8x128xf32>
    %87 = tpu.matmul %82, %11, %cst_32 {dimension_numbers = #tpu.dot_dimension_numbers<[1], [0], [0], [1], [0, 0, 1, 1], [], []>} : vector<8x32xf32>, vector<32x128xf32>, vector<8x128xf32> -> vector<8x128xf32>
    %88 = arith.addf %86, %87 : vector<8x128xf32>
    %89 = math.tanh %88 : vector<8x128xf32>
    %cst_33 = arith.constant 5.000000e-01 : f32
    %90 = vector.broadcast %cst_33 : f32 to vector<8x128xf32>
    %91 = arith.mulf %90, %89 : vector<8x128xf32>
    %cst_34 = arith.constant 5.000000e-01 : f32
    %92 = vector.broadcast %cst_34 : f32 to vector<8x128xf32>
    %93 = arith.addf %91, %92 : vector<8x128xf32>
    %94 = arith.select %17, %89, %93 : vector<8x128xi1>, vector<8x128xf32>
    %95 = vector.extract_strided_slice %94 {offsets = [0, 0], sizes = [8, 32], strides = [1, 1]} : vector<8x128xf32> to vector<8x32xf32>
    %96 = vector.extract_strided_slice %94 {offsets = [0, 32], sizes = [8, 32], strides = [1, 1]} : vector<8x128xf32> to vector<8x32xf32>
    %97 = vector.extract_strided_slice %94 {offsets = [0, 64], sizes = [8, 32], strides = [1, 1]} : vector<8x128xf32> to vector<8x32xf32>
    %98 = vector.extract_strided_slice %94 {offsets = [0, 96], sizes = [8, 32], strides = [1, 1]} : vector<8x128xf32> to vector<8x32xf32>
    %99 = arith.mulf %96, %80 : vector<8x32xf32>
    %100 = arith.mulf %95, %97 : vector<8x32xf32>
    %101 = arith.addf %99, %100 : vector<8x32xf32>
    %102 = math.tanh %101 : vector<8x32xf32>
    %103 = arith.mulf %98, %102 : vector<8x32xf32>
    %c4_i32 = arith.constant 4 : i32
    %c8_i32_35 = arith.constant 8 : i32
    %104 = arith.muli %c4_i32, %c8_i32_35 : i32
    %105 = tpu.assume_multiple %104, 8 : i32
    %106 = arith.index_cast %105 : i32 to index
    %c0_36 = arith.constant 0 : index
    %107 = vector.load %arg9[%106, %c0_36] : memref<64x128xf32, #tpu.memory_space<vmem>>, vector<8x128xf32>
    %cst_37 = arith.constant dense<0.000000e+00> : vector<8x128xf32>
    %108 = tpu.matmul %103, %11, %cst_37 {dimension_numbers = #tpu.dot_dimension_numbers<[1], [0], [0], [1], [0, 0, 1, 1], [], []>} : vector<8x32xf32>, vector<32x128xf32>, vector<8x128xf32> -> vector<8x128xf32>
    %109 = arith.addf %107, %108 : vector<8x128xf32>
    %110 = math.tanh %109 : vector<8x128xf32>
    %cst_38 = arith.constant 5.000000e-01 : f32
    %111 = vector.broadcast %cst_38 : f32 to vector<8x128xf32>
    %112 = arith.mulf %111, %110 : vector<8x128xf32>
    %cst_39 = arith.constant 5.000000e-01 : f32
    %113 = vector.broadcast %cst_39 : f32 to vector<8x128xf32>
    %114 = arith.addf %112, %113 : vector<8x128xf32>
    %115 = arith.select %17, %110, %114 : vector<8x128xi1>, vector<8x128xf32>
    %116 = vector.extract_strided_slice %115 {offsets = [0, 0], sizes = [8, 32], strides = [1, 1]} : vector<8x128xf32> to vector<8x32xf32>
    %117 = vector.extract_strided_slice %115 {offsets = [0, 32], sizes = [8, 32], strides = [1, 1]} : vector<8x128xf32> to vector<8x32xf32>
    %118 = vector.extract_strided_slice %115 {offsets = [0, 64], sizes = [8, 32], strides = [1, 1]} : vector<8x128xf32> to vector<8x32xf32>
    %119 = vector.extract_strided_slice %115 {offsets = [0, 96], sizes = [8, 32], strides = [1, 1]} : vector<8x128xf32> to vector<8x32xf32>
    %120 = arith.mulf %117, %101 : vector<8x32xf32>
    %121 = arith.mulf %116, %118 : vector<8x32xf32>
    %122 = arith.addf %120, %121 : vector<8x32xf32>
    %123 = math.tanh %122 : vector<8x32xf32>
    %124 = arith.mulf %119, %123 : vector<8x32xf32>
    %c5_i32 = arith.constant 5 : i32
    %c8_i32_40 = arith.constant 8 : i32
    %125 = arith.muli %c5_i32, %c8_i32_40 : i32
    %126 = tpu.assume_multiple %125, 8 : i32
    %127 = arith.index_cast %126 : i32 to index
    %c0_41 = arith.constant 0 : index
    %128 = vector.load %arg9[%127, %c0_41] : memref<64x128xf32, #tpu.memory_space<vmem>>, vector<8x128xf32>
    %cst_42 = arith.constant dense<0.000000e+00> : vector<8x128xf32>
    %129 = tpu.matmul %124, %11, %cst_42 {dimension_numbers = #tpu.dot_dimension_numbers<[1], [0], [0], [1], [0, 0, 1, 1], [], []>} : vector<8x32xf32>, vector<32x128xf32>, vector<8x128xf32> -> vector<8x128xf32>
    %130 = arith.addf %128, %129 : vector<8x128xf32>
    %131 = math.tanh %130 : vector<8x128xf32>
    %cst_43 = arith.constant 5.000000e-01 : f32
    %132 = vector.broadcast %cst_43 : f32 to vector<8x128xf32>
    %133 = arith.mulf %132, %131 : vector<8x128xf32>
    %cst_44 = arith.constant 5.000000e-01 : f32
    %134 = vector.broadcast %cst_44 : f32 to vector<8x128xf32>
    %135 = arith.addf %133, %134 : vector<8x128xf32>
    %136 = arith.select %17, %131, %135 : vector<8x128xi1>, vector<8x128xf32>
    %137 = vector.extract_strided_slice %136 {offsets = [0, 0], sizes = [8, 32], strides = [1, 1]} : vector<8x128xf32> to vector<8x32xf32>
    %138 = vector.extract_strided_slice %136 {offsets = [0, 32], sizes = [8, 32], strides = [1, 1]} : vector<8x128xf32> to vector<8x32xf32>
    %139 = vector.extract_strided_slice %136 {offsets = [0, 64], sizes = [8, 32], strides = [1, 1]} : vector<8x128xf32> to vector<8x32xf32>
    %140 = vector.extract_strided_slice %136 {offsets = [0, 96], sizes = [8, 32], strides = [1, 1]} : vector<8x128xf32> to vector<8x32xf32>
    %141 = arith.mulf %138, %122 : vector<8x32xf32>
    %142 = arith.mulf %137, %139 : vector<8x32xf32>
    %143 = arith.addf %141, %142 : vector<8x32xf32>
    %144 = math.tanh %143 : vector<8x32xf32>
    %145 = arith.mulf %140, %144 : vector<8x32xf32>
    %c6_i32 = arith.constant 6 : i32
    %c8_i32_45 = arith.constant 8 : i32
    %146 = arith.muli %c6_i32, %c8_i32_45 : i32
    %147 = tpu.assume_multiple %146, 8 : i32
    %148 = arith.index_cast %147 : i32 to index
    %c0_46 = arith.constant 0 : index
    %149 = vector.load %arg9[%148, %c0_46] : memref<64x128xf32, #tpu.memory_space<vmem>>, vector<8x128xf32>
    %cst_47 = arith.constant dense<0.000000e+00> : vector<8x128xf32>
    %150 = tpu.matmul %145, %11, %cst_47 {dimension_numbers = #tpu.dot_dimension_numbers<[1], [0], [0], [1], [0, 0, 1, 1], [], []>} : vector<8x32xf32>, vector<32x128xf32>, vector<8x128xf32> -> vector<8x128xf32>
    %151 = arith.addf %149, %150 : vector<8x128xf32>
    %152 = math.tanh %151 : vector<8x128xf32>
    %cst_48 = arith.constant 5.000000e-01 : f32
    %153 = vector.broadcast %cst_48 : f32 to vector<8x128xf32>
    %154 = arith.mulf %153, %152 : vector<8x128xf32>
    %cst_49 = arith.constant 5.000000e-01 : f32
    %155 = vector.broadcast %cst_49 : f32 to vector<8x128xf32>
    %156 = arith.addf %154, %155 : vector<8x128xf32>
    %157 = arith.select %17, %152, %156 : vector<8x128xi1>, vector<8x128xf32>
    %158 = vector.extract_strided_slice %157 {offsets = [0, 0], sizes = [8, 32], strides = [1, 1]} : vector<8x128xf32> to vector<8x32xf32>
    %159 = vector.extract_strided_slice %157 {offsets = [0, 32], sizes = [8, 32], strides = [1, 1]} : vector<8x128xf32> to vector<8x32xf32>
    %160 = vector.extract_strided_slice %157 {offsets = [0, 64], sizes = [8, 32], strides = [1, 1]} : vector<8x128xf32> to vector<8x32xf32>
    %161 = vector.extract_strided_slice %157 {offsets = [0, 96], sizes = [8, 32], strides = [1, 1]} : vector<8x128xf32> to vector<8x32xf32>
    %162 = arith.mulf %159, %143 : vector<8x32xf32>
    %163 = arith.mulf %158, %160 : vector<8x32xf32>
    %164 = arith.addf %162, %163 : vector<8x32xf32>
    %165 = math.tanh %164 : vector<8x32xf32>
    %166 = arith.mulf %161, %165 : vector<8x32xf32>
    %c7_i32 = arith.constant 7 : i32
    %c8_i32_50 = arith.constant 8 : i32
    %167 = arith.muli %c7_i32, %c8_i32_50 : i32
    %168 = tpu.assume_multiple %167, 8 : i32
    %169 = arith.index_cast %168 : i32 to index
    %c0_51 = arith.constant 0 : index
    %170 = vector.load %arg9[%169, %c0_51] : memref<64x128xf32, #tpu.memory_space<vmem>>, vector<8x128xf32>
    %cst_52 = arith.constant dense<0.000000e+00> : vector<8x128xf32>
    %171 = tpu.matmul %166, %11, %cst_52 {dimension_numbers = #tpu.dot_dimension_numbers<[1], [0], [0], [1], [0, 0, 1, 1], [], []>} : vector<8x32xf32>, vector<32x128xf32>, vector<8x128xf32> -> vector<8x128xf32>
    %172 = arith.addf %170, %171 : vector<8x128xf32>
    %173 = math.tanh %172 : vector<8x128xf32>
    %cst_53 = arith.constant 5.000000e-01 : f32
    %174 = vector.broadcast %cst_53 : f32 to vector<8x128xf32>
    %175 = arith.mulf %174, %173 : vector<8x128xf32>
    %cst_54 = arith.constant 5.000000e-01 : f32
    %176 = vector.broadcast %cst_54 : f32 to vector<8x128xf32>
    %177 = arith.addf %175, %176 : vector<8x128xf32>
    %178 = arith.select %17, %173, %177 : vector<8x128xi1>, vector<8x128xf32>
    %179 = vector.extract_strided_slice %178 {offsets = [0, 0], sizes = [8, 32], strides = [1, 1]} : vector<8x128xf32> to vector<8x32xf32>
    %180 = vector.extract_strided_slice %178 {offsets = [0, 32], sizes = [8, 32], strides = [1, 1]} : vector<8x128xf32> to vector<8x32xf32>
    %181 = vector.extract_strided_slice %178 {offsets = [0, 64], sizes = [8, 32], strides = [1, 1]} : vector<8x128xf32> to vector<8x32xf32>
    %182 = vector.extract_strided_slice %178 {offsets = [0, 96], sizes = [8, 32], strides = [1, 1]} : vector<8x128xf32> to vector<8x32xf32>
    %183 = arith.mulf %180, %164 : vector<8x32xf32>
    %184 = arith.mulf %179, %181 : vector<8x32xf32>
    %185 = arith.addf %183, %184 : vector<8x32xf32>
    %186 = math.tanh %185 : vector<8x32xf32>
    %187 = arith.mulf %182, %186 : vector<8x32xf32>
    %c8_i32_55 = arith.constant 8 : i32
    %c0_56 = arith.constant 0 : index
    %c0_57 = arith.constant 0 : index
    %188 = vector.load %arg10[%c0_56, %c0_57] : memref<8x32xf32, #tpu.memory_space<vmem>>, vector<8x32xf32>
    tpu.vector_store %arg10[%c0_56, %c0_57], %187 {strides = array<i32>} : memref<8x32xf32, #tpu.memory_space<vmem>>, vector<8x32xf32>,
    %c0_58 = arith.constant 0 : index
    %c0_59 = arith.constant 0 : index
    %189 = vector.load %arg11[%c0_58, %c0_59] : memref<8x32xf32, #tpu.memory_space<vmem>>, vector<8x32xf32>
    tpu.vector_store %arg11[%c0_58, %c0_59], %185 {strides = array<i32>} : memref<8x32xf32, #tpu.memory_space<vmem>>, vector<8x32xf32>,
    %c0_i32_60 = arith.constant 0 : i32
    %190 = arith.cmpi eq, %arg1, %c0_i32_60 : i32
    %191 = arith.extui %190 : i1 to i32
    %c0_i32_61 = arith.constant 0 : i32
    %192 = arith.cmpi ne, %191, %c0_i32_61 : i32
    scf.if %192 {
      %c0_62 = arith.constant 0 : index
      %c0_63 = arith.constant 0 : index
      %193 = vector.load %arg6[%c0_62, %c0_63] : memref<32x8xf32, #tpu.memory_space<vmem>>, vector<32x8xf32>
      %cst_64 = arith.constant dense<0.000000e+00> : vector<8x8xf32>
      %194 = tpu.matmul %187, %193, %cst_64 {dimension_numbers = #tpu.dot_dimension_numbers<[1], [0], [0], [1], [0, 0, 1, 1], [], []>} : vector<8x32xf32>, vector<32x8xf32>, vector<8x8xf32> -> vector<8x8xf32>
      %c0_65 = arith.constant 0 : index
      %c0_66 = arith.constant 0 : index
      %195 = vector.load %arg7[%c0_65, %c0_66] : memref<1x8xf32, #tpu.memory_space<vmem>>, vector<1x8xf32>
      %196 = vector.broadcast %195 : vector<1x8xf32> to vector<8x8xf32>
      %197 = arith.addf %194, %196 : vector<8x8xf32>
      %c0_67 = arith.constant 0 : index
      %c0_68 = arith.constant 0 : index
      %198 = vector.load %arg8[%c0_67, %c0_68] : memref<8x8xf32, #tpu.memory_space<vmem>>, vector<8x8xf32>
      tpu.vector_store %arg8[%c0_67, %c0_68], %197 {strides = array<i32>} : memref<8x8xf32, #tpu.memory_space<vmem>>, vector<8x8xf32>,
    } else {
    }
    return
  }
  func.func @transform_0(%arg0: i32, %arg1: i32) -> (i32, i32, i32) {
    %c0_i32 = arith.constant 0 : i32
    %c0_i32_0 = arith.constant 0 : i32
    return %arg0, %arg1, %c0_i32 : i32, i32, i32
  }
  func.func @transform_1(%arg0: i32, %arg1: i32) -> (i32, i32) {
    %c0_i32 = arith.constant 0 : i32
    %c0_i32_0 = arith.constant 0 : i32
    %c0_i32_1 = arith.constant 0 : i32
    return %c0_i32, %c0_i32_0 : i32, i32
  }
  func.func @transform_2(%arg0: i32, %arg1: i32) -> (i32, i32) {
    %c0_i32 = arith.constant 0 : i32
    %c0_i32_0 = arith.constant 0 : i32
    %c0_i32_1 = arith.constant 0 : i32
    return %c0_i32, %c0_i32_0 : i32, i32
  }
  func.func @transform_3(%arg0: i32, %arg1: i32) -> (i32, i32) {
    %c0_i32 = arith.constant 0 : i32
    %c0_i32_0 = arith.constant 0 : i32
    %c0_i32_1 = arith.constant 0 : i32
    return %c0_i32, %c0_i32_0 : i32, i32
  }
  func.func @transform_4(%arg0: i32, %arg1: i32) -> (i32, i32) {
    %c0_i32 = arith.constant 0 : i32
    %c0_i32_0 = arith.constant 0 : i32
    %c0_i32_1 = arith.constant 0 : i32
    return %c0_i32, %c0_i32_0 : i32, i32
  }
  func.func @transform_5(%arg0: i32, %arg1: i32) -> (i32, i32) {
    %c0_i32 = arith.constant 0 : i32
    %c0_i32_0 = arith.constant 0 : i32
    %c0_i32_1 = arith.constant 0 : i32
    return %c0_i32, %c0_i32_0 : i32, i32
  }
  func.func @transform_6(%arg0: i32, %arg1: i32) -> (i32, i32) {
    %c0_i32 = arith.constant 0 : i32
    %c0_i32_0 = arith.constant 0 : i32
    return %arg0, %c0_i32 : i32, i32
  }
}

</mosaic_0001>

<bundles_post_ra>
// kernel: tpu_custom_call.1
= control target key start
LH: loop header
LB: loop body
LE: loop exit
PB: predicated region body
PF: predicated region fallthrough
CT: control target
= control target key end

     0   :  { %vm28_vm0 = vcmask 261120   ;;  %vm45_vm1 = vcmask 130048   ;;  %v671_v4 = vmov 0.0   ;;  %s907_s0 = inlined_call_operand.vmem [shape: f32[1,64,16], index: 0, kind: input, shape index: {}]   ;;  %s908_s1 = inlined_call_operand.vmem [shape: f32[16,128], index: 1, kind: input, shape index: {}]   ;;  %s909_s2 = inlined_call_operand.vmem [shape: f32[32,128], index: 2, kind: input, shape index: {}]   ;;  %s910_s3 = inlined_call_operand.vmem [shape: f32[1,128], index: 3, kind: input, shape index: {}]   ;;  %s911_s4 = inlined_call_operand.vmem [shape: f32[32,8], index: 4, kind: input, shape index: {}]   ;;  %s912_s5 = inlined_call_operand.vmem [shape: f32[1,8], index: 5, kind: input, shape index: {}]   ;;  %s913_s6 = inlined_call_operand.hbm [shape: f32[8,8], index: 6, kind: output, shape index: {}]  }
   0x1   :  { %v40_v0 = vld [vmem:[%s908_s1 + $0x8] sm:$0xff]  ;;  %v39_v1 = vld [vmem:[%s908_s1] sm:$0xff]  ;;  %v723_v3 = vld [vmem:[%s909_s2 + $0x18] sm:$0xff]  ;;  %29 = vst.msk [vmem:[#allocation3] sm:$0xff] %vm28_vm0, %v671_v4 }
   0x2   :  { %602 = vmatpush.msra.mxu1 %v40_v0  ;;  %v36_v2 = vld [vmem:[%s907_s0 + $0x28] sm:$0xff]  ;;  %84 = vmatpush.msra.mxu0 %v40_v0  ;;  %v31_v5 = vld [vmem:[%s907_s0] sm:$0xff]  ;;  %30 = vst.msk [vmem:[#allocation4] sm:$0xff] %vm28_vm0, %v671_v4 }
   0x3   :  { %603 = vmatpush.msra.mxu2 %v40_v0  ;;  %249 = vmatpush.msra.mxu3 %v723_v3 }
   0x4   :  { %604 = vmatpush.msra.mxu1 %v39_v1  ;;  %85 = vmatpush.msra.mxu0 %v39_v1 }
   0x5   :  { %11 = vsyncpa [#allocation6], 0  ;;  %590 = vmatmul.msk.f32.vlgmr.msra.gmra.mxu1 %vm45_vm1, %v36_v2  ;;  %v735_v6 = vld [vmem:[%s909_s2 + $0x10] sm:$0xff]  ;;  %585 = vmatmul.msk.f32.vlgmr.msra.gmra.mxu0 %vm45_vm1, %v31_v5  ;;  %v742_v7 = vld [vmem:[%s909_s2 + $0x8] sm:$0xff]  ;;  %v123_v15 = vlaneseq  ;;  %s673_s13 = smov 32   ;;  %s675_s11 = smov [#allocation5]  }
   0x6   :  { %147 = vmatpush.msrb.mxu1 %v723_v3  ;;  %605 = vmatpush.msra.mxu2 %v39_v1  ;;  %v750_v8 = vld [vmem:[%s909_s2] sm:$0xff]  ;;  %v37_v31 = vld [vmem:[%s907_s0 + $0x30] sm:$0xff]  ;;  %v38_v32 = vld [vmem:[%s907_s0 + $0x38] sm:$0xff]  ;;  %vm567_vm5 = vcmask 64512  }
   0x7   :  { %250 = vmatpush.msra.mxu3 %v735_v6  ;;  %v777_v12 = vld [vmem:[%s910_s3] ss:$0 sm:$0xff]  ;;  %v124_v17 = vand.u32 127, %v123_v15  ;;  %s672_s3 = smov 64   ;;  %591 = vmatmul.msk.f32.vlgmr.msra.gmra.mxu2 %vm45_vm1, %v37_v31  ;;  %v32_v35 = vld [vmem:[%s907_s0 + $0x8] sm:$0xff]  ;;  %v33_v55 = vld [vmem:[%s907_s0 + $0x10] sm:$0xff] }
   0x8   :  { %200 = vmatpush.msrb.mxu2 %v723_v3  ;;  %148 = vmatpush.msrb.mxu1 %v735_v6  ;;  %v128_v9 = vld [vmem:[#allocation3] sm:$0xff]  ;;  %v540_v20 = vld [vmem:[%s911_s4 + $0x18] sm:$0xff] }
   0x9   :  { %251 = vmatpush.msra.mxu3 %v742_v7  ;;  %vm125_vm2 = vcmp.ge.s32.totalorder %v124_v17, 64  ;;  %vm126_vm3 = vcmp.lt.s32.totalorder %v124_v17, 96  ;;  %v129_v23 = vld [vmem:[#allocation4] sm:$0xff] }
   0xa   :  { %201 = vmatpush.msrb.mxu2 %v735_v6  ;;  %149 = vmatpush.msrb.mxu1 %v742_v7  ;;  %vm780_vm4 = vmand %vm125_vm2, %vm126_vm3 }
   0xb   :  { %252 = vmatpush.msra.mxu3 %v750_v8 }
   0xc   :  { %202 = vmatpush.msrb.mxu2 %v742_v7  ;;  %150 = vmatpush.msrb.mxu1 %v750_v8 }
   0xd   :  { %396 = vmatpush.msrb.mxu3 %v723_v3  ;;  %593 = vmatmul.msk.f32.vlgmr.msrb.gmra.mxu1 %vm28_vm0, %v128_v9 }
   0xe   :  { %203 = vmatpush.msrb.mxu2 %v750_v8  ;;  %298 = vmatpush.msra.mxu1 %v723_v3 }
   0xf   :  { %397 = vmatpush.msrb.mxu3 %v735_v6  ;;  %592 = vmatmul.msk.f32.gmra.mxu2 %vm45_vm1, %v38_v32 }
  0x10   :  { %299 = vmatpush.msra.mxu1 %v735_v6  ;;  %347 = vmatpush.msra.mxu2 %v723_v3 }
  0x11   :  { %398 = vmatpush.msrb.mxu3 %v742_v7  ;;  %586 = vmatmul.msk.f32.gmra.mxu0 %vm45_vm1, %v32_v35 }
  0x12   :  { %300 = vmatpush.msra.mxu1 %v742_v7  ;;  %348 = vmatpush.msra.mxu2 %v735_v6 }
  0x13   :  { %399 = vmatpush.msrb.mxu3 %v750_v8 }
  0x14   :  { %301 = vmatpush.msra.mxu1 %v750_v8  ;;  %349 = vmatpush.msra.mxu2 %v742_v7 }
  0x16   :  { %445 = vmatpush.msrb.mxu1 %v723_v3  ;;  %350 = vmatpush.msra.mxu2 %v750_v8 }
  0x18   :  { %446 = vmatpush.msrb.mxu1 %v735_v6 }
  0x19   :  { %587 = vmatmul.msk.f32.gmra.mxu0 %vm45_vm1, %v33_v55 }
  0x1a   :  { %447 = vmatpush.msrb.mxu1 %v742_v7 }
  0x1c   :  { %448 = vmatpush.msrb.mxu1 %v750_v8 }
  0x82   :  { %v772_v10 = vpop.f32.mrf.mxu1  ;;  %v87_v11 = vpop.f32.mrf.mxu0 }
  0x83   :  { %v88_v13 = vadd.f32 %v777_v12, %v87_v11 }
  0x8a   :  { %v152_v14 = vpop.f32.mrf.mxu1  ;;  %v812_v37 = vpop.f32.mrf.mxu2 }
  0x8b   :  { %v155_v16 = vadd.f32 %v152_v14, %v88_v13 }
  0x8d   :  { %613 = vtanh.f32 %v155_v16 }
  0x8e   :  { %v90_v39 = vpop.f32.mrf.mxu0 }
  0x8f   :  { %v91_v40 = vadd.f32 %v777_v12, %v90_v39 }
  0x92   :  { %v814_v38 = vpop.f32.mrf.mxu2 }
  0x93   :  { %v614_v18 = vpop.eup %613 }
  0x94   :  { %v157_v19 = vmul.f32 0.5, %v614_v18 }
  0x96   :  { %v158_v21 = vadd.f32 0.5, %v157_v19  ;;  %v93_v57 = vpop.f32.mrf.mxu0 }
  0x97   :  { %v94_v58 = vadd.f32 %v777_v12, %v93_v57 }
  0x98   :  { %v159_v22 = vsel %vm780_vm4, %v614_v18, %v158_v21 }
  0x99   :  { %166 = vrot.lane.b32.xlu0 %v159_v22, %s672_s3 }
  0xa1   :  { %161 = vrot.lane.b32.xlu0 %v129_v23, %s673_s13 }
 0x10b   :  { %v167_v24 = vpop.permute.xlu0 %166 }
 0x10c   :  { %v169_v25 = vmul.f32 %v167_v24, %v159_v22 }
 0x10e   :  { %171 = vrot.lane.b32.xlu1 %v169_v25, %s673_s13 }
 0x113   :  { %v162_v26 = vpop.permute.xlu0 %161 }
 0x114   :  { %v164_v27 = vmul.f32 %v162_v26, %v159_v22 }
 0x180   :  { %v172_v28 = vpop.permute.xlu1 %171 }
 0x181   :  { %v174_v29 = vadd.f32 %v172_v28, %v164_v27 }
 0x183   :  { %615 = vtanh.f32 %v174_v29 }
 0x189   :  { %v616_v30 = vpop.eup %615 }
 0x18a   :  { %177 = vrot.lane.b32.xlu1 %v616_v30, %s672_s3  ;;  %v35_v30 = vld [vmem:[%s907_s0 + $0x20] sm:$0xff] }
 0x1fc   :  { %v178_v33 = vpop.permute.xlu1 %177 }
 0x1fd   :  { %v180_v34 = vmul.f32 %v178_v33, %v159_v22 }
 0x1ff   :  { %184 = vrot.lane.b32.xlu2 %v180_v34, %s673_s13 }
 0x259   :  { %v185_v36 = vpop.permute.xlu2 %184 }
 0x25a   :  { %594 = vmatmul.msk.f32.vlgmr.msrb.gmra.mxu2 %vm28_vm0, %v185_v36 }
 0x25b   :  { %494 = vmatpush.msrb.mxu2 %v723_v3 }
 0x25d   :  { %495 = vmatpush.msrb.mxu2 %v735_v6 }
 0x25f   :  { %496 = vmatpush.msrb.mxu2 %v742_v7  ;;  %v34_v7 = vld [vmem:[%s907_s0 + $0x18] sm:$0xff]  ;;  %s674_s0 = smov 96  }
 0x260   :  { %588 = vmatmul.msk.f32.gmra.mxu0 %vm45_vm1, %v34_v7 }
 0x261   :  { %497 = vmatpush.msrb.mxu2 %v750_v8 }
 0x268   :  { %589 = vmatmul.msk.f32.gmra.mxu0 %vm45_vm1, %v35_v30 }
 0x2dd   :  { %v205_v41 = vpop.f32.mrf.mxu2  ;;  %v96_v13 = vpop.f32.mrf.mxu0 }
 0x2de   :  { %v208_v42 = vadd.f32 %v205_v41, %v91_v40  ;;  %v97_v14 = vadd.f32 %v777_v12, %v96_v13 }
 0x2e0   :  { %617 = vtanh.f32 %v208_v42 }
 0x2e5   :  { %v99_v32 = vpop.f32.mrf.mxu0 }
 0x2e6   :  { %v618_v43 = vpop.eup %617  ;;  %v100_v33 = vadd.f32 %v777_v12, %v99_v32  ;;  %v538_v32 = vld [vmem:[%s911_s4 + $0x8] sm:$0xff] }
 0x2e7   :  { %v210_v44 = vmul.f32 0.5, %v618_v43 }
 0x2e9   :  { %v211_v45 = vadd.f32 0.5, %v210_v44 }
 0x2eb   :  { %v212_v46 = vsel %vm780_vm4, %v618_v43, %v211_v45 }
 0x2ec   :  { %215 = vrot.lane.b32.xlu2 %v212_v46, %s672_s3  ;;  %v213_v49 = vmul.f32 %v212_v46, %v174_v29 }
 0x346   :  { %v216_v47 = vpop.permute.xlu2 %215 }
 0x347   :  { %v218_v48 = vmul.f32 %v216_v47, %v212_v46 }
 0x349   :  { %220 = vrot.lane.b32.xlu0 %v218_v48, %s673_s13 }
 0x3bb   :  { %v221_v50 = vpop.permute.xlu0 %220 }
 0x3bc   :  { %v223_v51 = vadd.f32 %v221_v50, %v213_v49 }
 0x3be   :  { %619 = vtanh.f32 %v223_v51 }
 0x3c4   :  { %v620_v52 = vpop.eup %619 }
 0x3c5   :  { %226 = vrot.lane.b32.xlu1 %v620_v52, %s672_s3 }
 0x437   :  { %v227_v53 = vpop.permute.xlu1 %226 }
 0x438   :  { %v229_v54 = vmul.f32 %v227_v53, %v212_v46 }
 0x43a   :  { %233 = vrot.lane.b32.xlu2 %v229_v54, %s673_s13 }
 0x494   :  { %v234_v56 = vpop.permute.xlu2 %233 }
 0x495   :  { %595 = vmatmul.msk.f32.vlgmr.msra.gmra.mxu3 %vm28_vm0, %v234_v56 }
 0x496   :  { %559 = vmatpush.msra.mxu3 %v540_v20 }
 0x518   :  { %v254_v59 = vpop.f32.mrf.mxu3 }
 0x519   :  { %v257_v60 = vadd.f32 %v254_v59, %v94_v58 }
 0x51b   :  { %621 = vtanh.f32 %v257_v60 }
 0x521   :  { %v622_v61 = vpop.eup %621 }
 0x522   :  { %v259_v62 = vmul.f32 0.5, %v622_v61 }
 0x524   :  { %v260_v63 = vadd.f32 0.5, %v259_v62 }
 0x526   :  { %v261_v0 = vsel %vm780_vm4, %v622_v61, %v260_v63 }
 0x527   :  { %264 = vrot.lane.b32.xlu0 %v261_v0, %s672_s3  ;;  %v262_v3 = vmul.f32 %v261_v0, %v223_v51  ;;  %v103_v51 = vadd.f32 %v777_v12, %v772_v10 }
 0x599   :  { %v265_v1 = vpop.permute.xlu0 %264 }
 0x59a   :  { %v267_v2 = vmul.f32 %v265_v1, %v261_v0 }
 0x59c   :  { %269 = vrot.lane.b32.xlu1 %v267_v2, %s673_s13  ;;  %v106_v2 = vadd.f32 %v777_v12, %v812_v37 }
 0x60e   :  { %v270_v4 = vpop.permute.xlu1 %269 }
 0x60f   :  { %v272_v5 = vadd.f32 %v270_v4, %v262_v3 }
 0x611   :  { %623 = vtanh.f32 %v272_v5 }
 0x617   :  { %v624_v6 = vpop.eup %623 }
 0x618   :  { %275 = vrot.lane.b32.xlu2 %v624_v6, %s672_s3 }
 0x672   :  { %v276_v8 = vpop.permute.xlu2 %275 }
 0x673   :  { %v278_v9 = vmul.f32 %v276_v8, %v261_v0 }
 0x675   :  { %282 = vrot.lane.b32.xlu0 %v278_v9, %s673_s13 }
 0x6e7   :  { %v283_v11 = vpop.permute.xlu0 %282 }
 0x6e8   :  { %596 = vmatmul.msk.f32.vlgmr.msra.gmra.mxu1 %vm28_vm0, %v283_v11 }
 0x765   :  { %v303_v15 = vpop.f32.mrf.mxu1 }
 0x766   :  { %v306_v16 = vadd.f32 %v303_v15, %v97_v14 }
 0x768   :  { %625 = vtanh.f32 %v306_v16 }
 0x76e   :  { %v626_v17 = vpop.eup %625 }
 0x76f   :  { %v308_v18 = vmul.f32 0.5, %v626_v17 }
 0x771   :  { %v309_v19 = vadd.f32 0.5, %v308_v18 }
 0x773   :  { %v310_v21 = vsel %vm780_vm4, %v626_v17, %v309_v19  ;;  %v109_v19 = vadd.f32 %v777_v12, %v814_v38  ;;  %v539_v38 = vld [vmem:[%s911_s4 + $0x10] sm:$0xff] }
 0x774   :  { %313 = vrot.lane.b32.xlu1 %v310_v21, %s672_s3  ;;  %v311_v24 = vmul.f32 %v310_v21, %v272_v5  ;;  %560 = vmatpush.msra.mxu3 %v539_v38 }
 0x776   :  { %561 = vmatpush.msra.mxu3 %v538_v32 }
 0x7e6   :  { %v314_v22 = vpop.permute.xlu1 %313 }
 0x7e7   :  { %v316_v23 = vmul.f32 %v314_v22, %v310_v21 }
 0x7e9   :  { %318 = vrot.lane.b32.xlu2 %v316_v23, %s673_s13 }
 0x843   :  { %v319_v25 = vpop.permute.xlu2 %318 }
 0x844   :  { %v321_v26 = vadd.f32 %v319_v25, %v311_v24 }
 0x846   :  { %627 = vtanh.f32 %v321_v26 }
 0x84c   :  { %v628_v27 = vpop.eup %627 }
 0x84d   :  { %324 = vrot.lane.b32.xlu0 %v628_v27, %s672_s3 }
 0x8bf   :  { %v325_v28 = vpop.permute.xlu0 %324 }
 0x8c0   :  { %v327_v29 = vmul.f32 %v325_v28, %v310_v21 }
 0x8c2   :  { %331 = vrot.lane.b32.xlu1 %v327_v29, %s673_s13 }
 0x934   :  { %v332_v31 = vpop.permute.xlu1 %331 }
 0x935   :  { %597 = vmatmul.msk.f32.vlgmr.msra.gmra.mxu2 %vm28_vm0, %v332_v31 }
 0x9b8   :  { %v352_v34 = vpop.f32.mrf.mxu2 }
 0x9b9   :  { %v355_v35 = vadd.f32 %v352_v34, %v100_v33  ;;  %v537_v33 = vld [vmem:[%s911_s4] sm:$0xff]  ;;  %s574_s4 = sshll.u32 %s675_s11, 4  ;;  %s575_s4 = int_to_ptr.vmem [resolvable:$true] %s574_s4 }
 0x9ba   :  { %562 = vmatpush.msra.mxu3 %v537_v33 }
 0x9bb   :  { %629 = vtanh.f32 %v355_v35 }
 0x9c1   :  { %v630_v36 = vpop.eup %629 }
 0x9c2   :  { %v357_v39 = vmul.f32 0.5, %v630_v36 }
 0x9c4   :  { %v358_v40 = vadd.f32 0.5, %v357_v39 }
 0x9c6   :  { %v359_v41 = vsel %vm780_vm4, %v630_v36, %v358_v40  ;;  %v612_v40 = vld [vmem:[%s912_s5] ss:$0 sm:$0xff] }
 0x9c7   :  { %362 = vrot.lane.b32.xlu2 %v359_v41, %s672_s3  ;;  %v360_v44 = vmul.f32 %v359_v41, %v321_v26 }
 0xa21   :  { %v363_v42 = vpop.permute.xlu2 %362 }
 0xa22   :  { %v365_v43 = vmul.f32 %v363_v42, %v359_v41 }
 0xa24   :  { %367 = vrot.lane.b32.xlu0 %v365_v43, %s673_s13 }
 0xa96   :  { %v368_v45 = vpop.permute.xlu0 %367 }
 0xa97   :  { %v370_v46 = vadd.f32 %v368_v45, %v360_v44 }
 0xa99   :  { %631 = vtanh.f32 %v370_v46 }
 0xa9f   :  { %v632_v47 = vpop.eup %631 }
 0xaa0   :  { %373 = vrot.lane.b32.xlu1 %v632_v47, %s672_s3 }
 0xb12   :  { %v374_v48 = vpop.permute.xlu1 %373 }
 0xb13   :  { %v376_v49 = vmul.f32 %v374_v48, %v359_v41 }
 0xb15   :  { %380 = vrot.lane.b32.xlu2 %v376_v49, %s673_s13 }
 0xb6f   :  { %v381_v50 = vpop.permute.xlu2 %380 }
 0xb70   :  { %598 = vmatmul.msk.f32.vlgmr.msrb.gmra.mxu3 %vm28_vm0, %v381_v50 }
 0xbf3   :  { %v401_v52 = vpop.f32.mrf.mxu3 }
 0xbf4   :  { %v404_v53 = vadd.f32 %v401_v52, %v103_v51 }
 0xbf6   :  { %633 = vtanh.f32 %v404_v53 }
 0xbfc   :  { %v634_v54 = vpop.eup %633 }
 0xbfd   :  { %v406_v55 = vmul.f32 0.5, %v634_v54 }
 0xbff   :  { %v407_v56 = vadd.f32 0.5, %v406_v55 }
 0xc01   :  { %v408_v57 = vsel %vm780_vm4, %v634_v54, %v407_v56 }
 0xc02   :  { %411 = vrot.lane.b32.xlu0 %v408_v57, %s672_s3  ;;  %v409_v60 = vmul.f32 %v408_v57, %v370_v46 }
 0xc74   :  { %v412_v58 = vpop.permute.xlu0 %411 }
 0xc75   :  { %v414_v59 = vmul.f32 %v412_v58, %v408_v57 }
 0xc77   :  { %416 = vrot.lane.b32.xlu1 %v414_v59, %s673_s13 }
 0xce9   :  { %v417_v61 = vpop.permute.xlu1 %416 }
 0xcea   :  { %v419_v62 = vadd.f32 %v417_v61, %v409_v60 }
 0xcec   :  { %635 = vtanh.f32 %v419_v62 }
 0xcf2   :  { %v636_v10 = vpop.eup %635 }
 0xcf3   :  { %422 = vrot.lane.b32.xlu2 %v636_v10, %s672_s3 }
 0xd4d   :  { %v423_v63 = vpop.permute.xlu2 %422 }
 0xd4e   :  { %v425_v0 = vmul.f32 %v423_v63, %v408_v57 }
 0xd50   :  { %429 = vrot.lane.b32.xlu0 %v425_v0, %s673_s13 }
 0xdc2   :  { %v430_v1 = vpop.permute.xlu0 %429 }
 0xdc3   :  { %599 = vmatmul.msk.f32.vlgmr.msrb.gmra.mxu1 %vm28_vm0, %v430_v1 }
 0xe40   :  { %v450_v3 = vpop.f32.mrf.mxu1 }
 0xe41   :  { %v453_v4 = vadd.f32 %v450_v3, %v106_v2 }
 0xe43   :  { %637 = vtanh.f32 %v453_v4 }
 0xe49   :  { %v638_v5 = vpop.eup %637 }
 0xe4a   :  { %v455_v6 = vmul.f32 0.5, %v638_v5 }
 0xe4c   :  { %v456_v7 = vadd.f32 0.5, %v455_v6 }
 0xe4e   :  { %v457_v8 = vsel %vm780_vm4, %v638_v5, %v456_v7 }
 0xe4f   :  { %460 = vrot.lane.b32.xlu1 %v457_v8, %s672_s3  ;;  %v458_v13 = vmul.f32 %v457_v8, %v419_v62 }
 0xec1   :  { %v461_v9 = vpop.permute.xlu1 %460 }
 0xec2   :  { %v463_v11 = vmul.f32 %v461_v9, %v457_v8 }
 0xec4   :  { %465 = vrot.lane.b32.xlu2 %v463_v11, %s673_s13 }
 0xf1e   :  { %v466_v14 = vpop.permute.xlu2 %465 }
 0xf1f   :  { %v468_v15 = vadd.f32 %v466_v14, %v458_v13 }
 0xf21   :  { %639 = vtanh.f32 %v468_v15 }
 0xf27   :  { %v640_v37 = vpop.eup %639 }
 0xf28   :  { %471 = vrot.lane.b32.xlu0 %v640_v37, %s672_s3 }
 0xf9a   :  { %v472_v16 = vpop.permute.xlu0 %471 }
 0xf9b   :  { %v474_v17 = vmul.f32 %v472_v16, %v457_v8 }
 0xf9d   :  { %478 = vrot.lane.b32.xlu1 %v474_v17, %s673_s13 }
0x100f   :  { %v479_v18 = vpop.permute.xlu1 %478 }
0x1010   :  { %600 = vmatmul.msk.f32.vlgmr.msrb.gmra.mxu2 %vm28_vm0, %v479_v18 }
0x1093   :  { %v499_v21 = vpop.f32.mrf.mxu2 }
0x1094   :  { %v502_v22 = vadd.f32 %v499_v21, %v109_v19 }
0x1096   :  { %641 = vtanh.f32 %v502_v22 }
0x109c   :  { %v642_v23 = vpop.eup %641 }
0x109d   :  { %v504_v24 = vmul.f32 0.5, %v642_v23 }
0x109f   :  { %v505_v25 = vadd.f32 0.5, %v504_v24 }
0x10a1   :  { %v506_v26 = vsel %vm780_vm4, %v642_v23, %v505_v25 }
0x10a2   :  { %509 = vrot.lane.b32.xlu2 %v506_v26, %s672_s3  ;;  %v507_v29 = vmul.f32 %v506_v26, %v468_v15 }
0x10fc   :  { %v510_v27 = vpop.permute.xlu2 %509 }
0x10fd   :  { %v512_v28 = vmul.f32 %v510_v27, %v506_v26 }
0x10ff   :  { %514 = vrot.lane.b32.xlu0 %v512_v28, %s673_s13 }
0x1171   :  { %v515_v30 = vpop.permute.xlu0 %514 }
0x1172   :  { %v517_v31 = vadd.f32 %v515_v30, %v507_v29 }
0x1174   :  { %643 = vtanh.f32 %v517_v31  ;;  %530 = vrot.lane.b32.xlu0 %v517_v31, %s674_s0 }
0x117a   :  { %v644_v12 = vpop.eup %643 }
0x117b   :  { %520 = vrot.lane.b32.xlu1 %v644_v12, %s672_s3  ;;  %s576_s3 = sshll.u32 %s913_s6, 4  ;;  %s577_s3 = int_to_ptr.hbm [resolvable:$true] %s576_s3 }
0x11e6   :  { %v531_v34 = vpop.permute.xlu0 %530 }
0x11e7   :  { %533 = vst.msk [vmem:[#allocation4] sm:$0xff] %vm28_vm0, %v531_v34 }
0x11ed   :  { %v521_v35 = vpop.permute.xlu1 %520 }
0x11ee   :  { %v523_v36 = vmul.f32 %v521_v35, %v506_v26 }
0x11f0   :  { %525 = vrot.lane.b32.xlu2 %v523_v36, %s673_s13 }
0x124a   :  { %v526_v39 = vpop.permute.xlu2 %525 }
0x124b   :  { %528 = vst.msk [vmem:[#allocation3] sm:$0xff] %vm28_vm0, %v526_v39  ;;  %601 = vmatmul.msk.f32.vlgmr.msra.gmra.mxu3 %vm28_vm0, %v526_v39 }
0x12ce   :  { %v564_v41 = vpop.f32.mrf.mxu3 }
0x12cf   :  { %v565_v42 = vadd.f32 %v612_v40, %v564_v41 }
0x12d1   :  { %568 = vst.msk [vmem:[#allocation5] sm:$0xff] %vm567_vm5, %v565_v42 }
0x12d2   :  { %579 = dma.vmem_to_hbm [thread:$0]  %s575_s4, 128, %s577_s3, [#allocation6]  }
0x12d3   :  { %669 = dma.done.wait [#allocation6], 128  }
0x12d4   :  { %670 = vsyncadd [#allocation6], 4294967168 }
0x12d5   :  { %584 = vsyncpa [#allocation6], 1 }

</bundles_post_ra>
